<compile_context>
chip_gen: v5e
topology: v5e:2x2
jax: 0.10.0
libtpu: 0.0.40
codegen_flags: <defaults>
</compile_context>

<pallas_src>
import jax
import jax.numpy as jnp
from jax.experimental import pallas as pl
from jax.experimental.pallas import tpu as pltpu

# ----------------------------- config ---------------------------------------
EMBED_DIM = 128          # model_cfg.EMBED_DIM
IMG_IN_DIM = 2048        # se_resnext50_32x4d feature channels (module hardcodes 2048)
HALF_DIM = EMBED_DIM // 2

LN_EPS = 1e-5
BN_EPS = 1e-5
NORM_EPS = 1e-12         # F.normalize eps

# Rows of the packed small-parameter slab ([8, 128] f32 -> exactly one (8,128) tile).
_ROW_CONV_B = 0          # folded conv bias                     [E]
_ROW_LN1_G = 1           # domian_lang_fc LayerNorm gamma       [E]
_ROW_LN1_B = 2           # domian_lang_fc LayerNorm beta        [E]
_ROW_B1 = 3              # domian_lang_fc Linear1 bias          [E]
_ROW_B2 = 4              # domian_lang_fc Linear2 bias          [E]
_ROW_LN2_G = 5           # lang_motion_fc LayerNorm gamma       [E]
_ROW_LN2_B = 6           # lang_motion_fc LayerNorm beta        [E]
_ROW_B_FIN = 7           # [vis_motion_fc bias | lang_motion_fc bias]  [2H]


# --------------------------- kernel helpers ---------------------------------
def _layernorm(x, g, b):
    mu = jnp.mean(x, axis=-1, keepdims=True)
    var = jnp.mean((x - mu) * (x - mu), axis=-1, keepdims=True)
    return (x - mu) * jax.lax.rsqrt(var + LN_EPS) * g + b


# ------------------------------ fused kernel ---------------------------------
def heads_kernel(lang_ref, feat_ref, convw_ref, w1_ref, w2_ref, wfin_ref, vec_ref,
                 out_ref):
    """Fused SiameseNewStage2 heads.

    Visual path : (BN-folded) 1x1 conv -> ReLU ┐
    Language    : LN -> Linear -> ReLU -> Linear -> LN -> ReLU ┘
    Tail        : block-diagonal [2E, 2H] matmul + per-half L2 norm
    Output      : lane-dense [bm, 2H] slab = [visual | lang]
    """
    vec = vec_ref[...]                                   # [8, 128] f32, single DMA
    conv_b = vec[_ROW_CONV_B:_ROW_CONV_B + 1, :]
    ln1_g = vec[_ROW_LN1_G:_ROW_LN1_G + 1, :]
    ln1_b = vec[_ROW_LN1_B:_ROW_LN1_B + 1, :]
    b1 = vec[_ROW_B1:_ROW_B1 + 1, :]
    b2 = vec[_ROW_B2:_ROW_B2 + 1, :]
    ln2_g = vec[_ROW_LN2_G:_ROW_LN2_G + 1, :]
    ln2_b = vec[_ROW_LN2_B:_ROW_LN2_B + 1, :]
    b_fin = vec[_ROW_B_FIN:_ROW_B_FIN + 1, :]

    # ---------------- visual motion branch (BN folded into conv) ----------------
    v = jnp.dot(feat_ref[...], convw_ref[...],
                preferred_element_type=jnp.float32) + conv_b        # [bm, E]
    v = jnp.maximum(v, 0.0)

    # ---------------- language branch ----------------
    h = _layernorm(lang_ref[...].astype(jnp.float32), ln1_g, ln1_b)  # [bm, E]
    h = jnp.dot(h.astype(jnp.bfloat16), w1_ref[...],
                preferred_element_type=jnp.float32) + b1
    h = jnp.maximum(h, 0.0)
    h = jnp.dot(h.astype(jnp.bfloat16), w2_ref[...],
                preferred_element_type=jnp.float32) + b2
    h = _layernorm(h, ln2_g, ln2_b)
    h = jnp.maximum(h, 0.0)

    # ------------- fused block-diagonal tail: both final Linears at once --------
    # [bm, 2E] bf16 (128-lane aligned concat, no cross-lane shuffle)
    vh = jnp.concatenate([v.astype(jnp.bfloat16), h.astype(jnp.bfloat16)], axis=-1)
    y = jnp.dot(vh, wfin_ref[...], preferred_element_type=jnp.float32) + b_fin  # [bm, 2H]

    # Per-half L2 normalize via lane mask (F.normalize: x * rsqrt(max(sumsq, eps^2)))
    lane = jax.lax.broadcasted_iota(jnp.int32, y.shape, 1)
    is_vis = lane < HALF_DIM
    sq = y * y
    ss_v = jnp.sum(jnp.where(is_vis, sq, 0.0), axis=-1, keepdims=True)
    ss_l = jnp.sum(jnp.where(is_vis, 0.0, sq), axis=-1, keepdims=True)
    inv_v = jax.lax.rsqrt(jnp.maximum(ss_v, NORM_EPS * NORM_EPS))
    inv_l = jax.lax.rsqrt(jnp.maximum(ss_l, NORM_EPS * NORM_EPS))

    # Single lane-dense (128-lane) store: [visual | lang]
    out_ref[...] = y * jnp.where(is_vis, inv_v, inv_l)


# ------------------------------- wrapper --------------------------------------
def _round_up(x, m):
    return ((x + m - 1) // m) * m


def siamese_heads(lang_mean, vis_feats, ip):
    """lang_mean: [B, E] bf16, vis_feats: [B, 2048] bf16, ip: folded/packed params."""
    B = lang_mean.shape[0]
    E, C, H = EMBED_DIM, IMG_IN_DIM, HALF_DIM

    # Batch tiling: one block up to 512 rows; above that, >= 2 grid steps (v7x has
    # 2 TCs) capped at 1024 rows (double-buffered feat tile ~8 MiB at bm=1024).
    if B <= 512:
        bm = B
    else:
        bm = min(1024, _round_up(pl.cdiv(B, 2), 8))
    grid = (pl.cdiv(B, bm),)

    def rows(cols):                      # batch-tiled operand
        return pl.BlockSpec((bm, cols), lambda i: (i, 0))

    def whole(r, c):                     # weight / packed-param slab, constant block
        return pl.BlockSpec((r, c), lambda i: (0, 0))

    in_specs = [rows(E), rows(C),
                whole(C, E),             # conv_w_fused  [2048, 128] bf16
                whole(E, E),             # lang_w1       [128, 128]  bf16
                whole(E, E),             # lang_w2       [128, 128]  bf16
                whole(2 * E, 2 * H),     # w_final       [256, 128]  bf16 (block-diag)
                whole(8, E)]             # vec_params    [8, 128]    f32

    out = pl.pallas_call(
        heads_kernel,
        out_shape=jax.ShapeDtypeStruct((B, 2 * H), jnp.float32),
        grid=grid,
        in_specs=in_specs,
        out_specs=pl.BlockSpec((bm, 2 * H), lambda i: (i, 0)),
        compiler_params=pltpu.CompilerParams(
            dimension_semantics=("parallel",),
            vmem_limit_bytes=32 * 1024 * 1024),
    )(lang_mean, vis_feats,
      ip["conv_w_fused"], ip["lang_w1"], ip["lang_w2"],
      ip["w_final"], ip["vec_params"])

    return out[:, :H], out[:, H:]        # (visual_mo_embeds, lang_mo_embeds)


# --------------------------- parameter init ------------------------------------
def init_params(key):
    ks = jax.random.split(key, 16)
    E, C, H = EMBED_DIM, IMG_IN_DIM, HALF_DIM
    f32 = jnp.float32

    def lin(k, fan_in, fan_out):
        return jax.random.normal(k, (fan_in, fan_out), f32) * (1.0 / jnp.sqrt(fan_in))

    params = {
        # domian_vis_fc_bk: Conv2d(2048, E, 1) -> weight stored [Cin, E]
        "conv_w": lin(ks[0], C, E),
        "conv_b": jax.random.normal(ks[1], (1, E), f32) * 0.02,
        # vis_motion_fc: BatchNorm1d(E) + ReLU + Linear(E, E//2)
        "bn_g": jnp.ones((1, E), f32),
        "bn_b": jnp.zeros((1, E), f32),
        "bn_mean": jnp.zeros((1, E), f32),
        "bn_var": jnp.ones((1, E), f32),
        "vis_w": lin(ks[2], E, H),
        "vis_b": jax.random.normal(ks[3], (1, H), f32) * 0.02,
        # domian_lang_fc: LayerNorm(E), Linear(E,E), ReLU, Linear(E,E)
        "ln1_g": jnp.ones((1, E), f32),
        "ln1_b": jnp.zeros((1, E), f32),
        "lang_w1": lin(ks[4], E, E),
        "lang_b1": jax.random.normal(ks[5], (1, E), f32) * 0.02,
        "lang_w2": lin(ks[6], E, E),
        "lang_b2": jax.random.normal(ks[7], (1, E), f32) * 0.02,
        # lang_motion_fc: LayerNorm(E), ReLU, Linear(E, E//2)
        "ln2_g": jnp.ones((1, E), f32),
        "ln2_b": jnp.zeros((1, E), f32),
        "lang_w3": lin(ks[8], E, H),
        "lang_b3": jax.random.normal(ks[9], (1, H), f32) * 0.02,
        # logit_scale = nn.Parameter(torch.ones(()))
        "logit_scale": jnp.ones((), f32),
        # ---- stub backbone params (see TODO below) ----
        "bert_embed_table": jax.random.normal(ks[10], (1000, E), f32) * 0.02,
        "vis_stub_proj": jax.random.normal(ks[11], (3, C), f32) * 0.1,
    }
    return params


def prepare_inference_params(p):
    """Fold eval-mode BN into the 1x1 conv, pack small vectors, build the
    block-diagonal tail weight, and pre-cast matmul weights to bf16 (once).

    BN(conv(x)) = (x@W + b - mean) * g/sqrt(var+eps) + beta
                = x @ (W * s) + ((b - mean) * s + beta),  s = g/sqrt(var+eps)
    """
    E, H = EMBED_DIM, HALF_DIM
    scale = p["bn_g"] * jax.lax.rsqrt(p["bn_var"] + BN_EPS)          # [1, E]
    conv_w_fused = (p["conv_w"] * scale).astype(jnp.bfloat16)        # [C, E] bf16
    conv_b_fused = (p["conv_b"] - p["bn_mean"]) * scale + p["bn_b"]  # [1, E] f32

    # Packed small-parameter slab: [8, 128] f32, one DMA for all biases / LN params.
    vec_params = jnp.concatenate([
        conv_b_fused,                                           # row 0
        p["ln1_g"], p["ln1_b"],                                 # rows 1,2
        p["lang_b1"], p["lang_b2"],                             # rows 3,4
        p["ln2_g"], p["ln2_b"],                                 # rows 5,6
        jnp.concatenate([p["vis_b"], p["lang_b3"]], axis=-1),   # row 7: [vis_b|lang_b3]
    ], axis=0)                                                  # [8, 128] f32

    # Block-diagonal fused tail weight: [2E, 2H] = [256, 128]
    w_final = jnp.zeros((2 * E, 2 * H), jnp.float32)
    w_final = w_final.at[:E, :H].set(p["vis_w"])
    w_final = w_final.at[E:, H:].set(p["lang_w3"])

    return {
        "conv_w_fused": conv_w_fused,
        "lang_w1": p["lang_w1"].astype(jnp.bfloat16),
        "lang_w2": p["lang_w2"].astype(jnp.bfloat16),
        "w_final": w_final.astype(jnp.bfloat16),
        "vec_params": vec_params,
    }


# ----------------------- stubbed backbones (plain JAX glue) ---------------------
# TODO(synk): RobertaModel (frozen) and se_resnext50_32x4d pretrained backbones have
# no clean Pallas equivalent (large pretrained nets); replaced with deterministic stub
# feature extractors producing tensors of the correct shapes.
def bert_stub(params, input_ids, attention_mask):
    # -> [B, S, E] "last_hidden_state"
    emb = params["bert_embed_table"][input_ids]
    return emb * attention_mask[..., None].astype(jnp.float32)


def vis_backbone_stub(params, motion):
    # motion NCHW [B, 3, H, W] -> features [B, IMG_IN_DIM] (== [B, 2048, 1, 1] flattened)
    pooled = jnp.mean(motion, axis=(2, 3))                 # [B, 3]
    return pooled @ params["vis_stub_proj"]                # [B, 2048]


# ------------------------------- forward ----------------------------------------
def siamese_new_stage2_forward(params, infer_params,
                               nl_input_ids, nl_attention_mask, motion):
    # torch.squeeze(motion, 0): motion arrives as [1, B, 3, H, W]
    motion = jnp.squeeze(motion, axis=0)

    # language branch: BERT stub + mean over seq (done in wrapper so the kernel only
    # DMAs [B, E] bf16, not [B, S, E] f32)
    bert_hidden = bert_stub(params, nl_input_ids, nl_attention_mask)    # [B, S, E]
    lang_mean = jnp.mean(bert_hidden, axis=1).astype(jnp.bfloat16)      # [B, E] bf16

    # visual branch backbone
    feats = vis_backbone_stub(params, motion).astype(jnp.bfloat16)      # [B, 2048] bf16

    # fused Pallas heads
    visual_mo_embeds, lang_mo_embeds = siamese_heads(lang_mean, feats, infer_params)

    return ([(visual_mo_embeds, lang_mo_embeds)], params["logit_scale"])


# --------------------------- pure-JAX reference (f32) ---------------------------
def heads_reference(params, lang_mean_f32, feats_f32):
    def ln(x, g, b):
        mu = jnp.mean(x, axis=-1, keepdims=True)
        var = jnp.mean((x - mu) ** 2, axis=-1, keepdims=True)
        return (x - mu) / jnp.sqrt(var + LN_EPS) * g + b

    def l2n(x):
        n = jnp.linalg.norm(x, axis=-1, keepdims=True)
        return x / jnp.maximum(n, NORM_EPS)

    p = params
    v = feats_f32 @ p["conv_w"] + p["conv_b"]
    v = (v - p["bn_mean"]) * p["bn_g"] / jnp.sqrt(p["bn_var"] + BN_EPS) + p["bn_b"]
    v = jnp.maximum(v, 0.0)
    v = l2n(v @ p["vis_w"] + p["vis_b"])

    h = ln(lang_mean_f32, p["ln1_g"], p["ln1_b"])
    h = jnp.maximum(h @ p["lang_w1"] + p["lang_b1"], 0.0)
    h = h @ p["lang_w2"] + p["lang_b2"]
    h = jnp.maximum(ln(h, p["ln2_g"], p["ln2_b"]), 0.0)
    h = l2n(h @ p["lang_w3"] + p["lang_b3"])
    return v, h


# --------------------------------- main -----------------------------------------
if __name__ == "__main__":
    key = jax.random.PRNGKey(0)
    k_param, k_ids, k_motion = jax.random.split(key, 3)

    params = init_params(k_param)
    infer_params = prepare_inference_params(params)   # BN fold + pack + bf16 cast, once

    B, S = 8, 8
    nl_input_ids = jax.random.randint(k_ids, (B, S), 0, 1000, dtype=jnp.int32)
    nl_attention_mask = jnp.ones((B, S), dtype=jnp.int32)
    motion = jax.random.normal(k_motion, (1, B, 3, 16, 16), jnp.float32)

    (pairs, logit_scale) = siamese_new_stage2_forward(
        params, infer_params, nl_input_ids, nl_attention_mask, motion)
    visual_mo_embeds, lang_mo_embeds = pairs[0]

    jax.block_until_ready((visual_mo_embeds, lang_mo_embeds, logit_scale))

    assert visual_mo_embeds.shape == (B, HALF_DIM)
    assert lang_mo_embeds.shape == (B, HALF_DIM)
    assert logit_scale.shape == ()
    # embeddings are L2-normalized
    assert jnp.allclose(jnp.linalg.norm(visual_mo_embeds, axis=-1), 1.0, atol=1e-3)
    assert jnp.allclose(jnp.linalg.norm(lang_mo_embeds, axis=-1), 1.0, atol=1e-3)

    # compare against the f32 pure-JAX reference (loose tol: bf16 matmul path)
    bert_hidden = bert_stub(params, nl_input_ids, nl_attention_mask)
    lang_mean_f32 = jnp.mean(bert_hidden, axis=1)
    feats_f32 = vis_backbone_stub(params, jnp.squeeze(motion, axis=0))
    v_ref, h_ref = heads_reference(params, lang_mean_f32, feats_f32)
    assert jnp.allclose(visual_mo_embeds, v_ref, atol=5e-2), "visual mismatch"
    assert jnp.allclose(lang_mo_embeds, h_ref, atol=5e-2), "lang mismatch"

    print("KERNEL_OK")
</pallas_src>

<mosaic_0001>
module attributes {stable_mosaic.version = 11 : i64} {
  func.func @heads_kernel(%arg0: i32, %arg1: memref<8x128xbf16, #tpu.memory_space<vmem>>, %arg2: memref<8x2048xbf16, #tpu.memory_space<vmem>>, %arg3: memref<2048x128xbf16, #tpu.memory_space<vmem>>, %arg4: memref<128x128xbf16, #tpu.memory_space<vmem>>, %arg5: memref<128x128xbf16, #tpu.memory_space<vmem>>, %arg6: memref<256x128xbf16, #tpu.memory_space<vmem>>, %arg7: memref<8x128xf32, #tpu.memory_space<vmem>>, %arg8: memref<8x128xf32, #tpu.memory_space<vmem>>) attributes {dimension_semantics = [#tpu.dimension_semantics<parallel>], iteration_bounds = array<i64: 1>, scalar_prefetch = 0 : i64, scratch_operands = 0 : i64, tpu.core_type = #tpu.core_type<tc>, window_params = [{transform_indices = @transform_0, window_bounds = array<i64: 8, 128>}, {transform_indices = @transform_1, window_bounds = array<i64: 8, 2048>}, {pipeline_mode = #tpu.pipeline_mode<synchronous>, transform_indices = @transform_2, window_bounds = array<i64: 2048, 128>}, {pipeline_mode = #tpu.pipeline_mode<synchronous>, transform_indices = @transform_3, window_bounds = array<i64: 128, 128>}, {pipeline_mode = #tpu.pipeline_mode<synchronous>, transform_indices = @transform_4, window_bounds = array<i64: 128, 128>}, {pipeline_mode = #tpu.pipeline_mode<synchronous>, transform_indices = @transform_5, window_bounds = array<i64: 256, 128>}, {pipeline_mode = #tpu.pipeline_mode<synchronous>, transform_indices = @transform_6, window_bounds = array<i64: 8, 128>}, {transform_indices = @transform_7, window_bounds = array<i64: 8, 128>}]} {
    %c0 = arith.constant 0 : index
    %c0_0 = arith.constant 0 : index
    %0 = vector.load %arg7[%c0, %c0_0] : memref<8x128xf32, #tpu.memory_space<vmem>>, vector<8x128xf32>
    %1 = vector.extract_strided_slice %0 {offsets = [0, 0], sizes = [1, 128], strides = [1, 1]} : vector<8x128xf32> to vector<1x128xf32>
    %2 = vector.extract_strided_slice %0 {offsets = [1, 0], sizes = [1, 128], strides = [1, 1]} : vector<8x128xf32> to vector<1x128xf32>
    %3 = vector.extract_strided_slice %0 {offsets = [2, 0], sizes = [1, 128], strides = [1, 1]} : vector<8x128xf32> to vector<1x128xf32>
    %4 = vector.extract_strided_slice %0 {offsets = [3, 0], sizes = [1, 128], strides = [1, 1]} : vector<8x128xf32> to vector<1x128xf32>
    %5 = vector.extract_strided_slice %0 {offsets = [4, 0], sizes = [1, 128], strides = [1, 1]} : vector<8x128xf32> to vector<1x128xf32>
    %6 = vector.extract_strided_slice %0 {offsets = [5, 0], sizes = [1, 128], strides = [1, 1]} : vector<8x128xf32> to vector<1x128xf32>
    %7 = vector.extract_strided_slice %0 {offsets = [6, 0], sizes = [1, 128], strides = [1, 1]} : vector<8x128xf32> to vector<1x128xf32>
    %8 = vector.extract_strided_slice %0 {offsets = [7, 0], sizes = [1, 128], strides = [1, 1]} : vector<8x128xf32> to vector<1x128xf32>
    %c0_1 = arith.constant 0 : index
    %c0_2 = arith.constant 0 : index
    %9 = vector.load %arg2[%c0_1, %c0_2] : memref<8x2048xbf16, #tpu.memory_space<vmem>>, vector<8x2048xbf16>
    %c0_3 = arith.constant 0 : index
    %c0_4 = arith.constant 0 : index
    %10 = vector.load %arg3[%c0_3, %c0_4] : memref<2048x128xbf16, #tpu.memory_space<vmem>>, vector<2048x128xbf16>
    %cst = arith.constant dense<0.000000e+00> : vector<8x128xf32>
    %11 = tpu.matmul %9, %10, %cst {dimension_numbers = #tpu.dot_dimension_numbers<[1], [0], [0], [1], [0, 0, 1, 1], [], []>} : vector<8x2048xbf16>, vector<2048x128xbf16>, vector<8x128xf32> -> vector<8x128xf32>
    %12 = vector.broadcast %1 : vector<1x128xf32> to vector<8x128xf32>
    %13 = arith.addf %11, %12 : vector<8x128xf32>
    %cst_5 = arith.constant 0.000000e+00 : f32
    %14 = vector.broadcast %cst_5 : f32 to vector<8x128xf32>
    %15 = arith.maximumf %13, %14 : vector<8x128xf32>
    %c0_6 = arith.constant 0 : index
    %c0_7 = arith.constant 0 : index
    %16 = vector.load %arg1[%c0_6, %c0_7] : memref<8x128xbf16, #tpu.memory_space<vmem>>, vector<8x128xbf16>
    %17 = arith.extf %16 : vector<8x128xbf16> to vector<8x128xf32>
    %cst_8 = arith.constant dense<0.000000e+00> : vector<8xf32>
    %18 = vector.multi_reduction <add>, %17, %cst_8 [1] : vector<8x128xf32> to vector<8xf32>
    %19 = vector.shape_cast %18 : vector<8xf32> to vector<8x1xf32>
    %cst_9 = arith.constant 1.280000e+02 : f32
    %20 = vector.broadcast %cst_9 : f32 to vector<8x1xf32>
    %21 = arith.divf %19, %20 : vector<8x1xf32>
    %22 = vector.broadcast %21 : vector<8x1xf32> to vector<8x128xf32>
    %23 = arith.subf %17, %22 : vector<8x128xf32>
    %24 = vector.broadcast %21 : vector<8x1xf32> to vector<8x128xf32>
    %25 = arith.subf %17, %24 : vector<8x128xf32>
    %26 = arith.mulf %23, %25 : vector<8x128xf32>
    %cst_10 = arith.constant dense<0.000000e+00> : vector<8xf32>
    %27 = vector.multi_reduction <add>, %26, %cst_10 [1] : vector<8x128xf32> to vector<8xf32>
    %28 = vector.shape_cast %27 : vector<8xf32> to vector<8x1xf32>
    %cst_11 = arith.constant 1.280000e+02 : f32
    %29 = vector.broadcast %cst_11 : f32 to vector<8x1xf32>
    %30 = arith.divf %28, %29 : vector<8x1xf32>
    %31 = vector.broadcast %21 : vector<8x1xf32> to vector<8x128xf32>
    %32 = arith.subf %17, %31 : vector<8x128xf32>
    %cst_12 = arith.constant 9.99999974E-6 : f32
    %33 = vector.broadcast %cst_12 : f32 to vector<8x1xf32>
    %34 = arith.addf %30, %33 : vector<8x1xf32>
    %35 = math.rsqrt %34 : vector<8x1xf32>
    %36 = vector.broadcast %35 : vector<8x1xf32> to vector<8x128xf32>
    %37 = arith.mulf %32, %36 : vector<8x128xf32>
    %38 = vector.broadcast %2 : vector<1x128xf32> to vector<8x128xf32>
    %39 = arith.mulf %37, %38 : vector<8x128xf32>
    %40 = vector.broadcast %3 : vector<1x128xf32> to vector<8x128xf32>
    %41 = arith.addf %39, %40 : vector<8x128xf32>
    %42 = arith.truncf %41 : vector<8x128xf32> to vector<8x128xbf16>
    %c0_13 = arith.constant 0 : index
    %c0_14 = arith.constant 0 : index
    %43 = vector.load %arg4[%c0_13, %c0_14] : memref<128x128xbf16, #tpu.memory_space<vmem>>, vector<128x128xbf16>
    %cst_15 = arith.constant dense<0.000000e+00> : vector<8x128xf32>
    %44 = tpu.matmul %42, %43, %cst_15 {dimension_numbers = #tpu.dot_dimension_numbers<[1], [0], [0], [1], [0, 0, 1, 1], [], []>} : vector<8x128xbf16>, vector<128x128xbf16>, vector<8x128xf32> -> vector<8x128xf32>
    %45 = vector.broadcast %4 : vector<1x128xf32> to vector<8x128xf32>
    %46 = arith.addf %44, %45 : vector<8x128xf32>
    %cst_16 = arith.constant 0.000000e+00 : f32
    %47 = vector.broadcast %cst_16 : f32 to vector<8x128xf32>
    %48 = arith.maximumf %46, %47 : vector<8x128xf32>
    %49 = arith.truncf %48 : vector<8x128xf32> to vector<8x128xbf16>
    %c0_17 = arith.constant 0 : index
    %c0_18 = arith.constant 0 : index
    %50 = vector.load %arg5[%c0_17, %c0_18] : memref<128x128xbf16, #tpu.memory_space<vmem>>, vector<128x128xbf16>
    %cst_19 = arith.constant dense<0.000000e+00> : vector<8x128xf32>
    %51 = tpu.matmul %49, %50, %cst_19 {dimension_numbers = #tpu.dot_dimension_numbers<[1], [0], [0], [1], [0, 0, 1, 1], [], []>} : vector<8x128xbf16>, vector<128x128xbf16>, vector<8x128xf32> -> vector<8x128xf32>
    %52 = vector.broadcast %5 : vector<1x128xf32> to vector<8x128xf32>
    %53 = arith.addf %51, %52 : vector<8x128xf32>
    %cst_20 = arith.constant dense<0.000000e+00> : vector<8xf32>
    %54 = vector.multi_reduction <add>, %53, %cst_20 [1] : vector<8x128xf32> to vector<8xf32>
    %55 = vector.shape_cast %54 : vector<8xf32> to vector<8x1xf32>
    %cst_21 = arith.constant 1.280000e+02 : f32
    %56 = vector.broadcast %cst_21 : f32 to vector<8x1xf32>
    %57 = arith.divf %55, %56 : vector<8x1xf32>
    %58 = vector.broadcast %57 : vector<8x1xf32> to vector<8x128xf32>
    %59 = arith.subf %53, %58 : vector<8x128xf32>
    %60 = vector.broadcast %57 : vector<8x1xf32> to vector<8x128xf32>
    %61 = arith.subf %53, %60 : vector<8x128xf32>
    %62 = arith.mulf %59, %61 : vector<8x128xf32>
    %cst_22 = arith.constant dense<0.000000e+00> : vector<8xf32>
    %63 = vector.multi_reduction <add>, %62, %cst_22 [1] : vector<8x128xf32> to vector<8xf32>
    %64 = vector.shape_cast %63 : vector<8xf32> to vector<8x1xf32>
    %cst_23 = arith.constant 1.280000e+02 : f32
    %65 = vector.broadcast %cst_23 : f32 to vector<8x1xf32>
    %66 = arith.divf %64, %65 : vector<8x1xf32>
    %67 = vector.broadcast %57 : vector<8x1xf32> to vector<8x128xf32>
    %68 = arith.subf %53, %67 : vector<8x128xf32>
    %cst_24 = arith.constant 9.99999974E-6 : f32
    %69 = vector.broadcast %cst_24 : f32 to vector<8x1xf32>
    %70 = arith.addf %66, %69 : vector<8x1xf32>
    %71 = math.rsqrt %70 : vector<8x1xf32>
    %72 = vector.broadcast %71 : vector<8x1xf32> to vector<8x128xf32>
    %73 = arith.mulf %68, %72 : vector<8x128xf32>
    %74 = vector.broadcast %6 : vector<1x128xf32> to vector<8x128xf32>
    %75 = arith.mulf %73, %74 : vector<8x128xf32>
    %76 = vector.broadcast %7 : vector<1x128xf32> to vector<8x128xf32>
    %77 = arith.addf %75, %76 : vector<8x128xf32>
    %cst_25 = arith.constant 0.000000e+00 : f32
    %78 = vector.broadcast %cst_25 : f32 to vector<8x128xf32>
    %79 = arith.maximumf %77, %78 : vector<8x128xf32>
    %80 = arith.truncf %15 : vector<8x128xf32> to vector<8x128xbf16>
    %81 = arith.truncf %79 : vector<8x128xf32> to vector<8x128xbf16>
    %82 = tpu.concatenate %80, %81 in 1 : vector<8x128xbf16>, vector<8x128xbf16> -> vector<8x256xbf16>
    %c0_26 = arith.constant 0 : index
    %c0_27 = arith.constant 0 : index
    %83 = vector.load %arg6[%c0_26, %c0_27] : memref<256x128xbf16, #tpu.memory_space<vmem>>, vector<256x128xbf16>
    %cst_28 = arith.constant dense<0.000000e+00> : vector<8x128xf32>
    %84 = tpu.matmul %82, %83, %cst_28 {dimension_numbers = #tpu.dot_dimension_numbers<[1], [0], [0], [1], [0, 0, 1, 1], [], []>} : vector<8x256xbf16>, vector<256x128xbf16>, vector<8x128xf32> -> vector<8x128xf32>
    %85 = vector.broadcast %8 : vector<1x128xf32> to vector<8x128xf32>
    %86 = arith.addf %84, %85 : vector<8x128xf32>
    %87 = tpu.iota {dimensions = array<i32: 1>} : vector<8x128xi32>
    %c64_i32 = arith.constant 64 : i32
    %88 = vector.broadcast %c64_i32 : i32 to vector<8x128xi32>
    %89 = arith.cmpi slt, %87, %88 : vector<8x128xi32>
    %90 = arith.mulf %86, %86 : vector<8x128xf32>
    %cst_29 = arith.constant 0.000000e+00 : f32
    %91 = vector.broadcast %cst_29 : f32 to vector<8x128xf32>
    %92 = arith.select %89, %90, %91 : vector<8x128xi1>, vector<8x128xf32>
    %cst_30 = arith.constant dense<0.000000e+00> : vector<8xf32>
    %93 = vector.multi_reduction <add>, %92, %cst_30 [1] : vector<8x128xf32> to vector<8xf32>
    %94 = vector.shape_cast %93 : vector<8xf32> to vector<8x1xf32>
    %cst_31 = arith.constant 0.000000e+00 : f32
    %95 = vector.broadcast %cst_31 : f32 to vector<8x128xf32>
    %96 = arith.select %89, %95, %90 : vector<8x128xi1>, vector<8x128xf32>
    %cst_32 = arith.constant dense<0.000000e+00> : vector<8xf32>
    %97 = vector.multi_reduction <add>, %96, %cst_32 [1] : vector<8x128xf32> to vector<8xf32>
    %98 = vector.shape_cast %97 : vector<8xf32> to vector<8x1xf32>
    %cst_33 = arith.constant 1.000000e-24 : f32
    %99 = vector.broadcast %cst_33 : f32 to vector<8x1xf32>
    %100 = arith.maximumf %94, %99 : vector<8x1xf32>
    %101 = math.rsqrt %100 : vector<8x1xf32>
    %cst_34 = arith.constant 1.000000e-24 : f32
    %102 = vector.broadcast %cst_34 : f32 to vector<8x1xf32>
    %103 = arith.maximumf %98, %102 : vector<8x1xf32>
    %104 = math.rsqrt %103 : vector<8x1xf32>
    %105 = vector.shape_cast %101 : vector<8x1xf32> to vector<8x1xf32>
    %106 = vector.broadcast %105 : vector<8x1xf32> to vector<8x128xf32>
    %107 = vector.shape_cast %104 : vector<8x1xf32> to vector<8x1xf32>
    %108 = vector.broadcast %107 : vector<8x1xf32> to vector<8x128xf32>
    %109 = arith.select %89, %106, %108 : vector<8x128xi1>, vector<8x128xf32>
    %110 = arith.mulf %86, %109 : vector<8x128xf32>
    %c0_35 = arith.constant 0 : index
    %c0_36 = arith.constant 0 : index
    %111 = vector.load %arg8[%c0_35, %c0_36] : memref<8x128xf32, #tpu.memory_space<vmem>>, vector<8x128xf32>
    tpu.vector_store %arg8[%c0_35, %c0_36], %110 {strides = array<i32>} : memref<8x128xf32, #tpu.memory_space<vmem>>, vector<8x128xf32>,
    return
  }
  func.func @transform_0(%arg0: i32) -> (i32, i32) {
    %c0_i32 = arith.constant 0 : i32
    %c0_i32_0 = arith.constant 0 : i32
    return %arg0, %c0_i32 : i32, i32
  }
  func.func @transform_1(%arg0: i32) -> (i32, i32) {
    %c0_i32 = arith.constant 0 : i32
    %c0_i32_0 = arith.constant 0 : i32
    return %arg0, %c0_i32 : i32, i32
  }
  func.func @transform_2(%arg0: i32) -> (i32, i32) {
    %c0_i32 = arith.constant 0 : i32
    %c0_i32_0 = arith.constant 0 : i32
    %c0_i32_1 = arith.constant 0 : i32
    return %c0_i32, %c0_i32_0 : i32, i32
  }
  func.func @transform_3(%arg0: i32) -> (i32, i32) {
    %c0_i32 = arith.constant 0 : i32
    %c0_i32_0 = arith.constant 0 : i32
    %c0_i32_1 = arith.constant 0 : i32
    return %c0_i32, %c0_i32_0 : i32, i32
  }
  func.func @transform_4(%arg0: i32) -> (i32, i32) {
    %c0_i32 = arith.constant 0 : i32
    %c0_i32_0 = arith.constant 0 : i32
    %c0_i32_1 = arith.constant 0 : i32
    return %c0_i32, %c0_i32_0 : i32, i32
  }
  func.func @transform_5(%arg0: i32) -> (i32, i32) {
    %c0_i32 = arith.constant 0 : i32
    %c0_i32_0 = arith.constant 0 : i32
    %c0_i32_1 = arith.constant 0 : i32
    return %c0_i32, %c0_i32_0 : i32, i32
  }
  func.func @transform_6(%arg0: i32) -> (i32, i32) {
    %c0_i32 = arith.constant 0 : i32
    %c0_i32_0 = arith.constant 0 : i32
    %c0_i32_1 = arith.constant 0 : i32
    return %c0_i32, %c0_i32_0 : i32, i32
  }
  func.func @transform_7(%arg0: i32) -> (i32, i32) {
    %c0_i32 = arith.constant 0 : i32
    %c0_i32_0 = arith.constant 0 : i32
    return %arg0, %c0_i32 : i32, i32
  }
}

</mosaic_0001>

<bundles_post_ra>
// kernel: tpu_custom_call.1
= control target key start
LH: loop header
LB: loop body
LE: loop exit
PB: predicated region body
PF: predicated region fallthrough
CT: control target
= control target key end

     0   :  { %12 = vsyncpa [#allocation3], 0  ;;  %s2994_s0 = inlined_call_operand.hbm [shape: bf16[8,128], index: 0, kind: input, shape index: {}]   ;;  %s2995_s1 = inlined_call_operand.hbm [shape: bf16[8,2048], index: 1, kind: input, shape index: {}]   ;;  %s2996_s2 = inlined_call_operand.hbm [shape: bf16[2048,128], index: 2, kind: input, shape index: {}]   ;;  %s2997_s3 = inlined_call_operand.hbm [shape: bf16[128,128], index: 3, kind: input, shape index: {}]   ;;  %s2998_s4 = inlined_call_operand.hbm [shape: bf16[128,128], index: 4, kind: input, shape index: {}]   ;;  %s2999_s5 = inlined_call_operand.hbm [shape: bf16[256,128], index: 5, kind: input, shape index: {}]   ;;  %s3000_s6 = inlined_call_operand.hbm [shape: f32[8,128], index: 6, kind: input, shape index: {}]   ;;  %s3001_s7 = inlined_call_operand.hbm [shape: f32[8,128], index: 7, kind: output, shape index: {}]  }
   0x1   :  { %13 = vsyncpa [#allocation6], 0 }
   0x2   :  { %14 = vsyncpa [#allocation9], 0 }
   0x3   :  { %15 = vsyncpa [#allocation12], 0  ;;  %s33_s26 = sshll.u32 %s2995_s1, 4  ;;  %s34_s26 = int_to_ptr.hbm [resolvable:$true] %s33_s26 }
   0x4   :  { %16 = vsyncpa [#allocation4], 0  ;;  %s2881_s27 = smov [#allocation5]   ;;  %s56_s8 = sshll.u32 %s2997_s3, 4  ;;  %s57_s8 = int_to_ptr.hbm [resolvable:$true] %s56_s8 }
   0x5   :  { %s35_s28 = sshll.u32 %s2881_s27, 4  ;;  %s2882_s9 = smov [#allocation8]   ;;  %s36_s28 = int_to_ptr.vmem [resolvable:$true] %s35_s28 }
   0x6   :  { %38 = dma.hbm_to_vmem [thread:$0]  %s34_s26, 1024, %s36_s28, [#allocation6]  }
   0x7   :  { %s58_s10 = sshll.u32 %s2882_s9, 4  ;;  %s82_s13 = sshll.u32 %s2999_s5, 4  ;;  %s59_s10 = int_to_ptr.vmem [resolvable:$true] %s58_s10  ;;  %s83_s13 = int_to_ptr.hbm [resolvable:$true] %s82_s13 }
   0x8   :  { %s2883_s1 = smov 64   ;;  %s2884_s14 = smov 4  }
   0x9   :  { %64 = dma.hbm_to_vmem [thread:$0]  %s57_s8, 1024, %s59_s10, [#allocation9], %s2883_s1, %s2883_s1, %s2884_s14  }
   0xa   :  { %s22_s17 = sshll.u32 %s2994_s0, 4  ;;  %s2885_s18 = smov [#allocation11]   ;;  %s23_s17 = int_to_ptr.hbm [resolvable:$true] %s22_s17 }
   0xb   :  { %s84_s19 = sshll.u32 %s2885_s18, 4  ;;  %s2886_s3 = smov [#allocation2]   ;;  %s85_s19 = int_to_ptr.vmem [resolvable:$true] %s84_s19 }
   0xc   :  { %90 = dma.hbm_to_vmem [thread:$0]  %s83_s13, 2048, %s85_s19, [#allocation12], %s2883_s1, %s2883_s1, %s2884_s14  }
   0xd   :  { %s24_s20 = sshll.u32 %s2886_s3, 4  ;;  %s43_s5 = sshll.u32 %s2996_s2, 4  ;;  %s25_s20 = int_to_ptr.vmem [resolvable:$true] %s24_s20  ;;  %s44_s5 = int_to_ptr.hbm [resolvable:$true] %s43_s5 }
   0xe   :  { %27 = dma.hbm_to_vmem [thread:$0]  %s23_s17, 64, %s25_s20, [#allocation3]  }
   0xf   :  { %s69_s25 = sshll.u32 %s2998_s4, 4  ;;  %s2887_s26 = smov [#allocation7]   ;;  %s70_s25 = int_to_ptr.hbm [resolvable:$true] %s69_s25 }
  0x10   :  { %s45_s0 = sshll.u32 %s2887_s26, 4  ;;  %s2888_s27 = smov [#allocation10]   ;;  %s46_s0 = int_to_ptr.vmem [resolvable:$true] %s45_s0 }
  0x11   :  { %51 = dma.hbm_to_vmem [thread:$0]  %s44_s5, 16384, %s46_s0, [#allocation6], %s2883_s1, %s2883_s1, %s2884_s14  }
  0x12   :  { %s71_s28 = sshll.u32 %s2888_s27, 4  ;;  %s96_s8 = sshll.u32 %s3000_s6, 4  ;;  %s72_s28 = int_to_ptr.vmem [resolvable:$true] %s71_s28  ;;  %s97_s8 = int_to_ptr.hbm [resolvable:$true] %s96_s8 }
  0x13   :  { %77 = dma.hbm_to_vmem [thread:$0]  %s70_s25, 1024, %s72_s28, [#allocation9], %s2883_s1, %s2883_s1, %s2884_s14  }
  0x14   :  { %s2889_s2 = smov [#allocation13]  }
  0x15   :  { %s98_s9 = sshll.u32 %s2889_s2, 4  ;;  %s99_s9 = int_to_ptr.vmem [resolvable:$true] %s98_s9 }
  0x16   :  { %101 = dma.hbm_to_vmem [thread:$0]  %s97_s8, 128, %s99_s9, [#allocation12]  }
  0x17   :  { %2871 = dma.done.wait [#allocation3], 64  }
  0x18   :  { %2872 = vsyncadd [#allocation3], 4294967232 }
  0x19   :  { %2873 = dma.done.wait [#allocation6], 17408  }
  0x1a   :  { %2874 = vsyncadd [#allocation6], 4294949888 }
  0x1b   :  { %2875 = dma.done.wait [#allocation9], 2048  }
  0x1c   :  { %2876 = vsyncadd [#allocation9], 4294965248 }
  0x1d   :  { %2877 = dma.done.wait [#allocation12], 2176  }
  0x1e   :  { %2878 = vsyncadd [#allocation12], 4294965120  ;;  %v2953_v0 = vld [vmem:[#allocation2] sm:$0xf]  ;;  %v2520_v6 = vld [vmem:[#allocation7 + $0xb0] sm:$0xff]  ;;  %v2890_v51 = vmov 128.0  }
  0x1f   :  { %v2521_v1 = vld [vmem:[#allocation7 + $0xb8] sm:$0xff]  ;;  %v1430_v3 = vunpack.c.l.bf16 %v2953_v0  ;;  %v2504_v7 = vld [vmem:[#allocation7 + $0x30] sm:$0xff]  ;;  %v2519_v10 = vld [vmem:[#allocation7 + $0xa8] sm:$0xff]  ;;  %2669 = vrcp.f32 %v2890_v51  ;;  %s2891_s4 = smov [#allocation14]   ;;  %s1845_s12 = sshll.u32 %s3001_s7, 4  ;;  %s1846_s12 = int_to_ptr.hbm [resolvable:$true] %s1845_s12 }
  0x20   :  { %v2505_v2 = vld [vmem:[#allocation7 + $0x38] sm:$0xff]  ;;  %1246 = vmatpush.bf16.msra.mxu2 %v2521_v1  ;;  %v2528_v8 = vld [vmem:[#allocation7 + $0xf0] sm:$0xff]  ;;  %v2503_v11 = vld [vmem:[#allocation7 + $0x28] sm:$0xff]  ;;  %s1843_s6 = sshll.u32 %s2891_s4, 4  ;;  %s1844_s6 = int_to_ptr.vmem [resolvable:$true] %s1843_s6 }
  0x21   :  { %v2529_v4 = vld [vmem:[#allocation7 + $0xf8] sm:$0xff]  ;;  %1220 = vmatpush.bf16.msra.mxu0 %v2505_v2  ;;  %1431 = vadd.xlane.f32.xlu0 %v1430_v3  ;;  %v2512_v9 = vld [vmem:[#allocation7 + $0x70] sm:$0xff]  ;;  %v2527_v12 = vld [vmem:[#allocation7 + $0xe8] sm:$0xff] }
  0x22   :  { %v2513_v5 = vld [vmem:[#allocation7 + $0x78] sm:$0xff]  ;;  %1259 = vmatpush.bf16.msra.mxu3 %v2529_v4  ;;  %v2511_v13 = vld [vmem:[#allocation7 + $0x68] sm:$0xff]  ;;  %v2518_v14 = vld [vmem:[#allocation7 + $0xa0] sm:$0xff] }
  0x23   :  { %1233 = vmatpush.bf16.msra.mxu1 %v2513_v5  ;;  %v2502_v15 = vld [vmem:[#allocation7 + $0x20] sm:$0xff]  ;;  %v2517_v18 = vld [vmem:[#allocation7 + $0x98] sm:$0xff]  ;;  %v2516_v22 = vld [vmem:[#allocation7 + $0x90] sm:$0xff] }
  0x24   :  { %1247 = vmatpush.bf16.msra.mxu2 %v2520_v6  ;;  %v2526_v16 = vld [vmem:[#allocation7 + $0xe0] sm:$0xff]  ;;  %v2501_v19 = vld [vmem:[#allocation7 + $0x18] sm:$0xff]  ;;  %v2500_v23 = vld [vmem:[#allocation7 + $0x10] sm:$0xff] }
  0x25   :  { %1221 = vmatpush.bf16.msra.mxu0 %v2504_v7  ;;  %v2510_v17 = vld [vmem:[#allocation7 + $0x60] sm:$0xff]  ;;  %v2525_v20 = vld [vmem:[#allocation7 + $0xd8] sm:$0xff]  ;;  %v2524_v24 = vld [vmem:[#allocation7 + $0xd0] sm:$0xff]  ;;  %v2958_v61 = vpop.eup %2669 }
  0x26   :  { %1260 = vmatpush.bf16.msra.mxu3 %v2528_v8  ;;  %v2509_v21 = vld [vmem:[#allocation7 + $0x58] sm:$0xff]  ;;  %v2508_v25 = vld [vmem:[#allocation7 + $0x50] sm:$0xff]  ;;  %v2515_v26 = vld [vmem:[#allocation7 + $0x88] sm:$0xff]  ;;  %vm1438_vm0 = vweird.f32 %v2958_v61 }
  0x27   :  { %1234 = vmatpush.bf16.msra.mxu1 %v2512_v9  ;;  %v2499_v27 = vld [vmem:[#allocation7 + $0x8] sm:$0xff]  ;;  %v2514_v30 = vld [vmem:[#allocation7 + $0x80] sm:$0xff]  ;;  %v2553_v32 = vld [vmem:[#allocation7 + $0x1b8] sm:$0xff]  ;;  %v1434_v9 = vmul.f32 128.0, %v2958_v61 }
  0x28   :  { %1248 = vmatpush.bf16.msra.mxu2 %v2519_v10  ;;  %v2523_v28 = vld [vmem:[#allocation7 + $0xc8] sm:$0xff]  ;;  %v2498_v31 = vld [vmem:[#allocation7] sm:$0xff]  ;;  %v2537_v34 = vld [vmem:[#allocation7 + $0x138] sm:$0xff] }
  0x29   :  { %1222 = vmatpush.bf16.msra.mxu0 %v2503_v11  ;;  %v2507_v29 = vld [vmem:[#allocation7 + $0x48] sm:$0xff]  ;;  %v2522_v33 = vld [vmem:[#allocation7 + $0xc0] sm:$0xff]  ;;  %v2561_v35 = vld [vmem:[#allocation7 + $0x1f8] sm:$0xff] }
  0x2a   :  { %1261 = vmatpush.bf16.msra.mxu3 %v2527_v12  ;;  %v2506_v36 = vld [vmem:[#allocation7 + $0x40] sm:$0xff]  ;;  %v2545_v37 = vld [vmem:[#allocation7 + $0x178] sm:$0xff]  ;;  %v2552_v38 = vld [vmem:[#allocation7 + $0x1b0] sm:$0xff] }
  0x2b   :  { %1235 = vmatpush.bf16.msra.mxu1 %v2511_v13  ;;  %v2536_v39 = vld [vmem:[#allocation7 + $0x130] sm:$0xff]  ;;  %v2551_v42 = vld [vmem:[#allocation7 + $0x1a8] sm:$0xff]  ;;  %v2550_v46 = vld [vmem:[#allocation7 + $0x1a0] sm:$0xff] }
  0x2c   :  { %1249 = vmatpush.bf16.msra.mxu2 %v2518_v14  ;;  %v2560_v40 = vld [vmem:[#allocation7 + $0x1f0] sm:$0xff]  ;;  %v2535_v43 = vld [vmem:[#allocation7 + $0x128] sm:$0xff]  ;;  %v2534_v47 = vld [vmem:[#allocation7 + $0x120] sm:$0xff] }
  0x2d   :  { %1223 = vmatpush.bf16.msra.mxu0 %v2502_v15  ;;  %v2544_v41 = vld [vmem:[#allocation7 + $0x170] sm:$0xff]  ;;  %v2559_v44 = vld [vmem:[#allocation7 + $0x1e8] sm:$0xff]  ;;  %v2558_v48 = vld [vmem:[#allocation7 + $0x1e0] sm:$0xff] }
  0x2e   :  { %1262 = vmatpush.bf16.msra.mxu3 %v2526_v16  ;;  %v2543_v45 = vld [vmem:[#allocation7 + $0x168] sm:$0xff]  ;;  %v2542_v49 = vld [vmem:[#allocation7 + $0x160] sm:$0xff]  ;;  %v2549_v50 = vld [vmem:[#allocation7 + $0x198] sm:$0xff] }
  0x2f   :  { %1236 = vmatpush.bf16.msra.mxu1 %v2510_v17  ;;  %v2533_v52 = vld [vmem:[#allocation7 + $0x118] sm:$0xff]  ;;  %v2548_v55 = vld [vmem:[#allocation7 + $0x190] sm:$0xff]  ;;  %v2547_v59 = vld [vmem:[#allocation7 + $0x188] sm:$0xff] }
  0x30   :  { %1250 = vmatpush.bf16.msra.mxu2 %v2517_v18  ;;  %v2557_v53 = vld [vmem:[#allocation7 + $0x1d8] sm:$0xff]  ;;  %v2532_v56 = vld [vmem:[#allocation7 + $0x110] sm:$0xff]  ;;  %v132_v60 = vld [vmem:[#allocation5 + $0x8] sm:$0xff] }
  0x31   :  { %1224 = vmatpush.bf16.msra.mxu0 %v2501_v19  ;;  %v2541_v54 = vld [vmem:[#allocation7 + $0x158] sm:$0xff]  ;;  %v2556_v57 = vld [vmem:[#allocation7 + $0x1d0] sm:$0xff]  ;;  %v2531_v62 = vld [vmem:[#allocation7 + $0x108] sm:$0xff]  ;;  %v406_v1 = vunpack.c.l.b16 %v132_v60  ;;  %v407_v4 = vunpack.c.h.b16 %v132_v60  ;;  %v1435_v19 = vsub.f32 1.0, %v1434_v9 }
  0x32   :  { %1263 = vmatpush.bf16.msra.mxu3 %v2525_v20  ;;  %v2540_v58 = vld [vmem:[#allocation7 + $0x150] sm:$0xff]  ;;  %v2555_v63 = vld [vmem:[#allocation7 + $0x1c8] sm:$0xff]  ;;  %v131_v2 = vld [vmem:[#allocation5] sm:$0xff] }
  0x33   :  { %1237 = vmatpush.bf16.msra.mxu1 %v2509_v21  ;;  %v404_v5 = vunpack.c.l.b16 %v131_v2  ;;  %v2539_v6 = vld [vmem:[#allocation7 + $0x148] sm:$0xff]  ;;  %v2546_v7 = vld [vmem:[#allocation7 + $0x180] sm:$0xff]  ;;  %v422_v8 = vpack.c.b16 %v406_v1, %v406_v1  ;;  %v2585_v10 = vld [vmem:[#allocation7 + $0x2b8] sm:$0xff]  ;;  %v423_v12 = vpack.c.b16 %v407_v4, %v407_v4  ;;  %v405_v13 = vunpack.c.h.b16 %v131_v2 }
  0x34   :  { %1251 = vmatpush.bf16.msra.mxu2 %v2516_v22  ;;  %v2530_v14 = vld [vmem:[#allocation7 + $0x100] sm:$0xff]  ;;  %v2569_v16 = vld [vmem:[#allocation7 + $0x238] sm:$0xff]  ;;  %v2584_v21 = vld [vmem:[#allocation7 + $0x2b0] sm:$0xff] }
  0x35   :  { %1225 = vmatpush.bf16.msra.mxu0 %v2500_v23  ;;  %v420_v11 = vpack.c.b16 %v404_v5, %v404_v5  ;;  %v2554_v15 = vld [vmem:[#allocation7 + $0x1c0] sm:$0xff]  ;;  %v2593_v17 = vld [vmem:[#allocation7 + $0x2f8] sm:$0xff]  ;;  %v421_v20 = vpack.c.b16 %v405_v13, %v405_v13  ;;  %v2568_v23 = vld [vmem:[#allocation7 + $0x230] sm:$0xff] }
  0x36   :  { %1264 = vmatpush.bf16.msra.mxu3 %v2524_v24  ;;  %v2538_v18 = vld [vmem:[#allocation7 + $0x140] sm:$0xff]  ;;  %v2577_v22 = vld [vmem:[#allocation7 + $0x278] sm:$0xff]  ;;  %v2592_v24 = vld [vmem:[#allocation7 + $0x2f0] sm:$0xff] }
  0x37   :  { %1238 = vmatpush.bf16.msra.mxu1 %v2508_v25  ;;  %v1436_v25 = vmul.f32 %v2958_v61, %v1435_v19  ;;  %v2580_v51 = vld [vmem:[#allocation7 + $0x290] sm:$0xff]  ;;  %v136_v60 = vld [vmem:[#allocation5 + $0x28] sm:$0xff]  ;;  %v2617_v2 = vld [vmem:[#allocation7 + $0x3b8] sm:$0xff] }
  0x38   :  { %1252 = vmatpush.bf16.msra.mxu2 %v2515_v26  ;;  %v2583_v26 = vld [vmem:[#allocation7 + $0x2a8] sm:$0xff]  ;;  %v2562_v4 = vld [vmem:[#allocation7 + $0x200] sm:$0xff]  ;;  %v2616_v13 = vld [vmem:[#allocation7 + $0x3b0] sm:$0xff] }
  0x39   :  { %1226 = vmatpush.bf16.msra.mxu0 %v2499_v27  ;;  %v134_v27 = vld [vmem:[#allocation5 + $0x18] sm:$0xff]  ;;  %v2563_v0 = vld [vmem:[#allocation7 + $0x208] sm:$0xff]  ;;  %v2586_v5 = vld [vmem:[#allocation7 + $0x2c0] sm:$0xff] }
  0x3a   :  { %1265 = vmatpush.bf16.msra.mxu3 %v2523_v28  ;;  %v133_v28 = vld [vmem:[#allocation5 + $0x10] sm:$0xff]  ;;  %v2571_v1 = vld [vmem:[#allocation7 + $0x248] sm:$0xff] }
  0x3b   :  { %1239 = vmatpush.bf16.msra.mxu1 %v2507_v29  ;;  %v2576_v29 = vld [vmem:[#allocation7 + $0x270] sm:$0xff] }
  0x3c   :  { %1253 = vmatpush.bf16.msra.mxu2 %v2514_v30  ;;  %v2567_v30 = vld [vmem:[#allocation7 + $0x228] sm:$0xff] }
  0x3d   :  { %1227 = vmatpush.bf16.msra.mxu0 %v2498_v31  ;;  %v2591_v31 = vld [vmem:[#allocation7 + $0x2e8] sm:$0xff] }
  0x3e   :  { %1266 = vmatpush.bf16.msra.mxu3 %v2522_v33  ;;  %v408_v33 = vunpack.c.l.b16 %v133_v28 }
  0x3f   :  { %1240 = vmatpush.bf16.msra.mxu1 %v2506_v36  ;;  %1254 = vmatmul.bf16.vlgmr.msra.gmra.mxu2 %v422_v8  ;;  %v411_v36 = vunpack.c.h.b16 %v134_v27  ;;  %v2625_v8 = vld [vmem:[#allocation7 + $0x3f8] sm:$0xff] }
  0x40   :  { %1298 = vmatpush.bf16.msrb.mxu2 %v2553_v32  ;;  %1228 = vmatmul.bf16.vlgmr.msra.gmra.mxu0 %v420_v11  ;;  %v410_v32 = vunpack.c.l.b16 %v134_v27  ;;  %v2622_v27 = vld [vmem:[#allocation7 + $0x3e0] sm:$0xff] }
  0x41   :  { %1272 = vmatpush.bf16.msrb.mxu0 %v2537_v34  ;;  %1267 = vmatmul.bf16.vlgmr.msra.gmra.mxu3 %v423_v12  ;;  %v1437_v34 = vadd.f32 %v2958_v61, %v1436_v25  ;;  %v2570_v12 = vld [vmem:[#allocation7 + $0x240] sm:$0xff]  ;;  %v2607_v25 = vld [vmem:[#allocation7 + $0x368] sm:$0xff] }
  0x42   :  { %1311 = vmatpush.bf16.msrb.mxu3 %v2561_v35  ;;  %1241 = vmatmul.bf16.vlgmr.msra.gmra.mxu1 %v421_v20  ;;  %v2582_v35 = vld [vmem:[#allocation7 + $0x2a0] sm:$0xff]  ;;  %v2615_v20 = vld [vmem:[#allocation7 + $0x3a8] sm:$0xff] }
  0x43   :  { %1285 = vmatpush.bf16.msrb.mxu1 %v2545_v37  ;;  %v2575_v37 = vld [vmem:[#allocation7 + $0x268] sm:$0xff] }
  0x44   :  { %1299 = vmatpush.bf16.msrb.mxu2 %v2552_v38  ;;  %v2566_v38 = vld [vmem:[#allocation7 + $0x220] sm:$0xff] }
  0x45   :  { %1273 = vmatpush.bf16.msrb.mxu0 %v2536_v39  ;;  %v2590_v39 = vld [vmem:[#allocation7 + $0x2e0] sm:$0xff] }
  0x46   :  { %1312 = vmatpush.bf16.msrb.mxu3 %v2560_v40  ;;  %v426_v40 = vpack.c.b16 %v410_v32, %v410_v32  ;;  %v2612_v32 = vld [vmem:[#allocation7 + $0x390] sm:$0xff] }
  0x47   :  { %1286 = vmatpush.bf16.msrb.mxu1 %v2544_v41  ;;  %v424_v41 = vpack.c.b16 %v408_v33, %v408_v33  ;;  %v2605_v33 = vld [vmem:[#allocation7 + $0x358] sm:$0xff] }
  0x48   :  { %1300 = vmatpush.bf16.msrb.mxu2 %v2551_v42  ;;  %v2965_v42 = vsel %vm1438_vm0, %v2958_v61, %v1437_v34  ;;  %v135_v61 = vld [vmem:[#allocation5 + $0x20] sm:$0xff]  ;;  %v2596_v34 = vld [vmem:[#allocation7 + $0x310] sm:$0xff] }
  0x49   :  { %1274 = vmatpush.bf16.msrb.mxu0 %v2535_v43  ;;  %v2581_v43 = vld [vmem:[#allocation7 + $0x298] sm:$0xff]  ;;  %v413_v11 = vunpack.c.h.b16 %v135_v61 }
  0x4a   :  { %1313 = vmatpush.bf16.msrb.mxu3 %v2559_v44  ;;  %v427_v44 = vpack.c.b16 %v411_v36, %v411_v36  ;;  %v2611_v36 = vld [vmem:[#allocation7 + $0x388] sm:$0xff] }
  0x4b   :  { %1287 = vmatpush.bf16.msrb.mxu1 %v2543_v45  ;;  %v409_v45 = vunpack.c.h.b16 %v133_v28  ;;  %v429_v19 = vpack.c.b16 %v413_v11, %v413_v11  ;;  %v2613_v28 = vld [vmem:[#allocation7 + $0x398] sm:$0xff] }
  0x4c   :  { %1301 = vmatpush.bf16.msrb.mxu2 %v2550_v46  ;;  %v2574_v46 = vld [vmem:[#allocation7 + $0x260] sm:$0xff] }
  0x4d   :  { %1275 = vmatpush.bf16.msrb.mxu0 %v2534_v47 }
  0x4e   :  { %1314 = vmatpush.bf16.msrb.mxu3 %v2558_v48  ;;  %v2565_v48 = vld [vmem:[#allocation7 + $0x218] sm:$0xff] }
  0x4f   :  { %1288 = vmatpush.bf16.msrb.mxu1 %v2542_v49  ;;  %v2589_v49 = vld [vmem:[#allocation7 + $0x2d8] sm:$0xff] }
  0x50   :  { %1302 = vmatpush.bf16.msrb.mxu2 %v2549_v50 }
  0x51   :  { %1276 = vmatpush.bf16.msrb.mxu0 %v2533_v52  ;;  %v425_v52 = vpack.c.b16 %v409_v45, %v409_v45  ;;  %v2603_v45 = vld [vmem:[#allocation7 + $0x348] sm:$0xff] }
  0x52   :  { %1315 = vmatpush.bf16.msrb.mxu3 %v2557_v53 }
  0x53   :  { %1289 = vmatpush.bf16.msrb.mxu1 %v2541_v54  ;;  %v2573_v54 = vld [vmem:[#allocation7 + $0x258] sm:$0xff] }
  0x54   :  { %1303 = vmatpush.bf16.msrb.mxu2 %v2548_v55  ;;  %v2564_v55 = vld [vmem:[#allocation7 + $0x210] sm:$0xff] }
  0x55   :  { %1277 = vmatpush.bf16.msrb.mxu0 %v2532_v56  ;;  %v2588_v56 = vld [vmem:[#allocation7 + $0x2d0] sm:$0xff] }
  0x56   :  { %1316 = vmatpush.bf16.msrb.mxu3 %v2556_v57 }
  0x57   :  { %1290 = vmatpush.bf16.msrb.mxu1 %v2540_v58  ;;  %v2579_v58 = vld [vmem:[#allocation7 + $0x288] sm:$0xff] }
  0x58   :  { %1304 = vmatpush.bf16.msrb.mxu2 %v2547_v59  ;;  %v2572_v59 = vld [vmem:[#allocation7 + $0x250] sm:$0xff] }
  0x59   :  { %1278 = vmatpush.bf16.msrb.mxu0 %v2531_v62  ;;  %v2578_v62 = vld [vmem:[#allocation7 + $0x280] sm:$0xff] }
  0x5a   :  { %1317 = vmatpush.bf16.msrb.mxu3 %v2555_v63  ;;  %v414_v63 = vunpack.c.l.b16 %v136_v60 }
  0x5b   :  { %1291 = vmatpush.bf16.msrb.mxu1 %v2539_v6  ;;  %v412_v6 = vunpack.c.l.b16 %v135_v61  ;;  %v2627_v61 = vld [vmem:[#allocation8 + $0x8] sm:$0xff] }
  0x5c   :  { %1305 = vmatpush.bf16.msrb.mxu2 %v2546_v7  ;;  %v2601_v7 = vld [vmem:[#allocation7 + $0x338] sm:$0xff]  ;;  %v430_v9 = vpack.c.b16 %v414_v63, %v414_v63  ;;  %v2974_v63 = vld [vmem:[#allocation13] sm:$0xff] }
  0x5d   :  { %1279 = vmatpush.bf16.msrb.mxu0 %v2530_v14  ;;  %v2609_v14 = vld [vmem:[#allocation7 + $0x378] sm:$0xff] }
  0x5e   :  { %1318 = vmatpush.bf16.msrb.mxu3 %v2554_v15  ;;  %v428_v15 = vpack.c.b16 %v412_v6, %v412_v6  ;;  %v395_v6 = vperm.slane %v2974_v63, 0 }
  0x5f   :  { %1292 = vmatpush.bf16.msrb.mxu1 %v2538_v18  ;;  %1306 = vmatmul.bf16.vlgmr.msrb.gmra.mxu2 %v426_v40  ;;  %v2619_v40 = vld [vmem:[#allocation7 + $0x3c8] sm:$0xff] }
  0x60   :  { %1350 = vmatpush.bf16.msra.mxu2 %v2585_v10  ;;  %1280 = vmatmul.bf16.vlgmr.msrb.gmra.mxu0 %v424_v41  ;;  %v415_v10 = vunpack.c.h.b16 %v136_v60  ;;  %v137_v41 = vld [vmem:[#allocation5 + $0x30] sm:$0xff]  ;;  %v2630_v60 = vld [vmem:[#allocation8 + $0x20] sm:$0xff] }
  0x61   :  { %1324 = vmatpush.bf16.msra.mxu0 %v2569_v16  ;;  %1319 = vmatmul.bf16.vlgmr.msrb.gmra.mxu3 %v427_v44  ;;  %v2600_v16 = vld [vmem:[#allocation7 + $0x330] sm:$0xff]  ;;  %v2610_v44 = vld [vmem:[#allocation7 + $0x380] sm:$0xff] }
  0x62   :  { %1363 = vmatpush.bf16.msra.mxu3 %v2593_v17  ;;  %1293 = vmatmul.bf16.vlgmr.msrb.gmra.mxu1 %v425_v52  ;;  %v2624_v17 = vld [vmem:[#allocation7 + $0x3f0] sm:$0xff]  ;;  %v431_v18 = vpack.c.b16 %v415_v10, %v415_v10  ;;  %v2602_v52 = vld [vmem:[#allocation7 + $0x340] sm:$0xff] }
  0x63   :  { %1337 = vmatpush.bf16.msra.mxu1 %v2577_v22  ;;  %v2599_v22 = vld [vmem:[#allocation7 + $0x328] sm:$0xff]  ;;  %v2648_v10 = vld [vmem:[#allocation11 + $0x30] sm:$0xff] }
  0x64   :  { %1351 = vmatpush.bf16.msra.mxu2 %v2584_v21  ;;  %v2608_v21 = vld [vmem:[#allocation7 + $0x370] sm:$0xff] }
  0x65   :  { %1325 = vmatpush.bf16.msra.mxu0 %v2568_v23  ;;  %v2623_v23 = vld [vmem:[#allocation7 + $0x3e8] sm:$0xff] }
  0x66   :  { %1364 = vmatpush.bf16.msra.mxu3 %v2592_v24  ;;  %v2614_v24 = vld [vmem:[#allocation7 + $0x3a0] sm:$0xff] }
  0x67   :  { %1338 = vmatpush.bf16.msra.mxu1 %v2576_v29  ;;  %v2606_v29 = vld [vmem:[#allocation7 + $0x360] sm:$0xff] }
  0x68   :  { %1352 = vmatpush.bf16.msra.mxu2 %v2583_v26  ;;  %v2598_v26 = vld [vmem:[#allocation7 + $0x320] sm:$0xff] }
  0x69   :  { %1326 = vmatpush.bf16.msra.mxu0 %v2567_v30  ;;  %v2597_v30 = vld [vmem:[#allocation7 + $0x318] sm:$0xff] }
  0x6a   :  { %1365 = vmatpush.bf16.msra.mxu3 %v2591_v31  ;;  %v2621_v31 = vld [vmem:[#allocation7 + $0x3d8] sm:$0xff] }
  0x6b   :  { %1339 = vmatpush.bf16.msra.mxu1 %v2575_v37  ;;  %v138_v37 = vld [vmem:[#allocation5 + $0x38] sm:$0xff] }
  0x6c   :  { %1353 = vmatpush.bf16.msra.mxu2 %v2582_v35  ;;  %v2620_v35 = vld [vmem:[#allocation7 + $0x3d0] sm:$0xff] }
  0x6d   :  { %1327 = vmatpush.bf16.msra.mxu0 %v2566_v38  ;;  %v2604_v38 = vld [vmem:[#allocation7 + $0x350] sm:$0xff] }
  0x6e   :  { %1366 = vmatpush.bf16.msra.mxu3 %v2590_v39  ;;  %v2595_v39 = vld [vmem:[#allocation7 + $0x308] sm:$0xff] }
  0x6f   :  { %1340 = vmatpush.bf16.msra.mxu1 %v2574_v46  ;;  %v416_v46 = vunpack.c.l.b16 %v137_v41 }
  0x70   :  { %1354 = vmatpush.bf16.msra.mxu2 %v2581_v43  ;;  %v418_v43 = vunpack.c.l.b16 %v138_v37 }
  0x71   :  { %1328 = vmatpush.bf16.msra.mxu0 %v2565_v48  ;;  %v2618_v48 = vld [vmem:[#allocation7 + $0x3c0] sm:$0xff] }
  0x72   :  { %1367 = vmatpush.bf16.msra.mxu3 %v2589_v49  ;;  %v419_v49 = vunpack.c.h.b16 %v138_v37  ;;  %v1460_v37 = vperm.slane %v2974_v63, 2 }
  0x73   :  { %1341 = vmatpush.bf16.msra.mxu1 %v2573_v54  ;;  %v432_v54 = vpack.c.b16 %v416_v46, %v416_v46 }
  0x74   :  { %1355 = vmatpush.bf16.msra.mxu2 %v2580_v51  ;;  %v417_v51 = vunpack.c.h.b16 %v137_v41 }
  0x75   :  { %1329 = vmatpush.bf16.msra.mxu0 %v2564_v55  ;;  %v435_v55 = vpack.c.b16 %v419_v49, %v419_v49 }
  0x76   :  { %1368 = vmatpush.bf16.msra.mxu3 %v2588_v56  ;;  %v433_v56 = vpack.c.b16 %v417_v51, %v417_v51  ;;  %v2643_v51 = vld [vmem:[#allocation11 + $0x8] sm:$0xff] }
  0x77   :  { %1342 = vmatpush.bf16.msra.mxu1 %v2572_v59  ;;  %v2631_v59 = vld [vmem:[#allocation8 + $0x28] sm:$0xff] }
  0x78   :  { %1356 = vmatpush.bf16.msra.mxu2 %v2579_v58  ;;  %v2632_v58 = vld [vmem:[#allocation8 + $0x30] sm:$0xff] }
  0x79   :  { %1330 = vmatpush.bf16.msra.mxu0 %v2563_v0  ;;  %v2629_v0 = vld [vmem:[#allocation8 + $0x18] sm:$0xff] }
  0x7b   :  { %1343 = vmatpush.bf16.msra.mxu1 %v2571_v1 }
  0x7c   :  { %1357 = vmatpush.bf16.msra.mxu2 %v2578_v62  ;;  %v2626_v62 = vld [vmem:[#allocation8] sm:$0xff] }
  0x7d   :  { %1331 = vmatpush.bf16.msra.mxu0 %v2562_v4  ;;  %v2649_v4 = vld [vmem:[#allocation11 + $0x38] sm:$0xff] }
  0x7f   :  { %1358 = vmatmul.bf16.vlgmr.msra.gmra.mxu2 %v430_v9  ;;  %1344 = vmatpush.bf16.msra.mxu1 %v2570_v12 }
  0x80   :  { %1402 = vmatpush.bf16.msrb.mxu2 %v2617_v2  ;;  %1332 = vmatmul.bf16.vlgmr.msra.gmra.mxu0 %v428_v15 }
  0x81   :  { %1376 = vmatpush.bf16.msrb.mxu0 %v2601_v7 }
  0x82   :  { %1345 = vmatmul.bf16.vlgmr.msra.gmra.mxu1 %v429_v19  ;;  %v2646_v19 = vld [vmem:[#allocation11 + $0x20] sm:$0xff] }
  0x83   :  { %1389 = vmatpush.bf16.msrb.mxu1 %v2609_v14 }
  0x84   :  { %1403 = vmatpush.bf16.msrb.mxu2 %v2616_v13  ;;  %v2647_v13 = vld [vmem:[#allocation11 + $0x28] sm:$0xff] }
  0x85   :  { %1377 = vmatpush.bf16.msrb.mxu0 %v2600_v16 }
  0x87   :  { %1390 = vmatpush.bf16.msrb.mxu1 %v2608_v21 }
  0x88   :  { %1404 = vmatpush.bf16.msrb.mxu2 %v2615_v20 }
  0x89   :  { %1378 = vmatpush.bf16.msrb.mxu0 %v2599_v22 }
  0x8b   :  { %1391 = vmatpush.bf16.msrb.mxu1 %v2607_v25 }
  0x8c   :  { %1405 = vmatpush.bf16.msrb.mxu2 %v2614_v24 }
  0x8d   :  { %1379 = vmatpush.bf16.msrb.mxu0 %v2598_v26 }
  0x8f   :  { %1392 = vmatpush.bf16.msrb.mxu1 %v2606_v29 }
  0x90   :  { %1406 = vmatpush.bf16.msrb.mxu2 %v2613_v28 }
  0x91   :  { %1380 = vmatpush.bf16.msrb.mxu0 %v2597_v30 }
  0x93   :  { %1393 = vmatpush.bf16.msrb.mxu1 %v2605_v33 }
  0x94   :  { %v1432_v47 = vpop.xlane.xlu0 %1431  ;;  %1407 = vmatpush.bf16.msrb.mxu2 %v2612_v32 }
  0x95   :  { %v1440_v50 = vmul.f32 %v2965_v42, %v1432_v47  ;;  %1381 = vmatpush.bf16.msrb.mxu0 %v2596_v34  ;;  %v2594_v47 = vld [vmem:[#allocation7 + $0x300] sm:$0xff]  ;;  %v1458_v34 = vperm.slane %v2974_v63, 1 }
  0x97   :  { %v2970_v53 = vsub.f32 %v1430_v3, %v1440_v50  ;;  %v2587_v3 = vld [vmem:[#allocation7 + $0x2c8] sm:$0xff]  ;;  %1394 = vmatpush.bf16.msrb.mxu1 %v2604_v38  ;;  %v434_v50 = vpack.c.b16 %v418_v43, %v418_v43 }
  0x98   :  { %1369 = vmatpush.bf16.msra.mxu3 %v2587_v3  ;;  %1408 = vmatpush.bf16.msrb.mxu2 %v2611_v36  ;;  %v2628_v3 = vld [vmem:[#allocation8 + $0x10] sm:$0xff] }
  0x99   :  { %v1442_v57 = vmul.f32 %v2970_v53, %v2970_v53  ;;  %1382 = vmatpush.bf16.msrb.mxu0 %v2595_v39 }
  0x9b   :  { %1443 = vadd.xlane.f32.xlu0 %v1442_v57  ;;  %1395 = vmatpush.bf16.msrb.mxu1 %v2603_v45  ;;  %v2633_v57 = vld [vmem:[#allocation8 + $0x38] sm:$0xff] }
  0x9c   :  { %1370 = vmatpush.bf16.msra.mxu3 %v2586_v5  ;;  %1409 = vmatpush.bf16.msrb.mxu2 %v2610_v44 }
  0x9d   :  { %1383 = vmatpush.bf16.msrb.mxu0 %v2594_v47 }
  0x9f   :  { %1371 = vmatmul.bf16.vlgmr.msra.gmra.mxu3 %v431_v18  ;;  %1410 = vmatmul.bf16.vlgmr.msrb.gmra.mxu2 %v434_v50 }
  0xa0   :  { %1415 = vmatpush.bf16.msrb.mxu3 %v2625_v8  ;;  %1396 = vmatpush.bf16.msrb.mxu1 %v2602_v52 }
  0xa1   :  { %1384 = vmatmul.bf16.vlgmr.msrb.gmra.mxu0 %v432_v54  ;;  %1777 = vmatpush.bf16.msra.mxu2 %v2649_v4  ;;  %v2637_v4 = vld [vmem:[#allocation10 + $0x18] sm:$0xff] }
  0xa2   :  { %1528 = vmatpush.bf16.msra.mxu0 %v2633_v57  ;;  %v2640_v57 = vld [vmem:[#allocation10 + $0x30] sm:$0xff] }
  0xa3   :  { %1397 = vmatmul.bf16.vlgmr.msrb.gmra.mxu1 %v433_v56  ;;  %v2641_v56 = vld [vmem:[#allocation10 + $0x38] sm:$0xff] }
  0xa4   :  { %1416 = vmatpush.bf16.msrb.mxu3 %v2624_v17  ;;  %1608 = vmatpush.bf16.msra.mxu1 %v2641_v56 }
  0xa5   :  { %1778 = vmatpush.bf16.msra.mxu2 %v2648_v10 }
  0xa6   :  { %1529 = vmatpush.bf16.msra.mxu0 %v2632_v58 }
  0xa8   :  { %1417 = vmatpush.bf16.msrb.mxu3 %v2623_v23  ;;  %v2645_v23 = vld [vmem:[#allocation11 + $0x18] sm:$0xff]  ;;  %1609 = vmatpush.bf16.msra.mxu1 %v2640_v57  ;;  %v1641_v57 = vperm.slane %v2974_v63, 5 }
  0xa9   :  { %1779 = vmatpush.bf16.msra.mxu2 %v2647_v13 }
  0xaa   :  { %1530 = vmatpush.bf16.msra.mxu0 %v2631_v59 }
  0xac   :  { %1418 = vmatpush.bf16.msrb.mxu3 %v2622_v27 }
  0xad   :  { %1780 = vmatpush.bf16.msra.mxu2 %v2646_v19 }
  0xae   :  { %1531 = vmatpush.bf16.msra.mxu0 %v2630_v60 }
  0xb0   :  { %1419 = vmatpush.bf16.msrb.mxu3 %v2621_v31 }
  0xb1   :  { %1781 = vmatpush.bf16.msra.mxu2 %v2645_v23  ;;  %v1479_v23 = vperm.slane %v2974_v63, 3 }
  0xb2   :  { %1532 = vmatpush.bf16.msra.mxu0 %v2629_v0  ;;  %v2639_v0 = vld [vmem:[#allocation10 + $0x28] sm:$0xff] }
  0xb3   :  { %1610 = vmatpush.bf16.msra.mxu1 %v2639_v0 }
  0xb4   :  { %1420 = vmatpush.bf16.msrb.mxu3 %v2620_v35 }
  0xb6   :  { %1533 = vmatpush.bf16.msra.mxu0 %v2628_v3 }
  0xb8   :  { %1421 = vmatpush.bf16.msrb.mxu3 %v2619_v40  ;;  %v2644_v40 = vld [vmem:[#allocation11 + $0x10] sm:$0xff] }
  0xb9   :  { %1782 = vmatpush.bf16.msra.mxu2 %v2644_v40  ;;  %v2656_v40 = vld [vmem:[#allocation11 + $0x70] sm:$0xff] }
  0xba   :  { %1534 = vmatpush.bf16.msra.mxu0 %v2627_v61 }
  0xbc   :  { %1422 = vmatpush.bf16.msrb.mxu3 %v2618_v48 }
  0xbd   :  { %v1229_v1 = vpop.f32.mrf.mxu0  ;;  %1783 = vmatpush.bf16.msra.mxu2 %v2643_v51 }
  0xbe   :  { %1535 = vmatpush.bf16.msra.mxu0 %v2626_v62  ;;  %v1230_v12 = vadd.f32 %v1229_v1, %v395_v6  ;;  %v2638_v1 = vld [vmem:[#allocation10 + $0x20] sm:$0xff] }
  0xbf   :  { %1423 = vmatmul.bf16.vlgmr.msrb.gmra.mxu3 %v435_v55  ;;  %v1242_v2 = vpop.f32.mrf.mxu1  ;;  %v2642_v55 = vld [vmem:[#allocation11] sm:$0xff]  ;;  %1611 = vmatpush.bf16.msra.mxu1 %v2638_v1  ;;  %v1680_v1 = vperm.slane %v2974_v63, 7 }
  0xc0   :  { %v1243_v16 = vadd.f32 %v1242_v2, %v1230_v12 }
  0xc1   :  { %1784 = vmatpush.bf16.msra.mxu2 %v2642_v55 }
  0xc2   :  { %v1255_v7 = vpop.f32.mrf.mxu2 }
  0xc3   :  { %v1256_v22 = vadd.f32 %v1255_v7, %v1243_v16  ;;  %1612 = vmatpush.bf16.msra.mxu1 %v2637_v4  ;;  %v2636_v7 = vld [vmem:[#allocation10 + $0x10] sm:$0xff] }
  0xc4   :  { %v1268_v9 = vpop.f32.mrf.mxu3 }
  0xc5   :  { %v1231_v14 = vpop.f32.mrf.mxu0  ;;  %v1269_v28 = vadd.f32 %v1268_v9, %v1256_v22  ;;  %v2634_v22 = vld [vmem:[#allocation10] sm:$0xff] }
  0xc7   :  { %v1244_v15 = vpop.f32.mrf.mxu1  ;;  %1613 = vmatpush.bf16.msra.mxu1 %v2636_v7 }
  0xca   :  { %v1257_v17 = vpop.f32.mrf.mxu2 }
  0xcc   :  { %v1270_v18 = vpop.f32.mrf.mxu3 }
  0xdd   :  { %v1281_v25 = vpop.f32.mrf.mxu0 }
  0xde   :  { %v1282_v33 = vadd.f32 %v1281_v25, %v1269_v28 }
  0xdf   :  { %v1294_v26 = vpop.f32.mrf.mxu1 }
  0xe0   :  { %v1295_v41 = vadd.f32 %v1294_v26, %v1282_v33 }
  0xe2   :  { %v1307_v29 = vpop.f32.mrf.mxu2 }
  0xe3   :  { %v1308_v47 = vadd.f32 %v1307_v29, %v1295_v41  ;;  %v2655_v41 = vld [vmem:[#allocation11 + $0x68] sm:$0xff] }
  0xe4   :  { %v1320_v30 = vpop.f32.mrf.mxu3 }
  0xe5   :  { %v1283_v38 = vpop.f32.mrf.mxu0  ;;  %v1321_v52 = vadd.f32 %v1320_v30, %v1308_v47  ;;  %v2650_v47 = vld [vmem:[#allocation11 + $0x40] sm:$0xff] }
  0xe7   :  { %v1296_v39 = vpop.f32.mrf.mxu1 }
  0xe8   :  { %v2657_v39 = vld [vmem:[#allocation11 + $0x78] sm:$0xff] }
  0xe9   :  { %1790 = vmatpush.bf16.msra.mxu3 %v2657_v39 }
  0xea   :  { %v1309_v43 = vpop.f32.mrf.mxu2 }
  0xeb   :  { %v2654_v43 = vld [vmem:[#allocation11 + $0x60] sm:$0xff] }
  0xec   :  { %v1322_v45 = vpop.f32.mrf.mxu3 }
  0xed   :  { %1791 = vmatpush.bf16.msra.mxu3 %v2656_v40  ;;  %v2652_v45 = vld [vmem:[#allocation11 + $0x50] sm:$0xff] }
  0xf1   :  { %1792 = vmatpush.bf16.msra.mxu3 %v2655_v41 }
  0xf5   :  { %1793 = vmatpush.bf16.msra.mxu3 %v2654_v43 }
  0xfd   :  { %v1333_v49 = vpop.f32.mrf.mxu0 }
  0xfe   :  { %v1334_v58 = vadd.f32 %v1333_v49, %v1321_v52 }
  0xff   :  { %v1346_v50 = vpop.f32.mrf.mxu1 }
 0x100   :  { %v1347_v3 = vadd.f32 %v1346_v50, %v1334_v58 }
 0x102   :  { %v1359_v54 = vpop.f32.mrf.mxu2 }
 0x103   :  { %v1360_v2 = vadd.f32 %v1359_v54, %v1347_v3 }
 0x105   :  { %v1335_v59 = vpop.f32.mrf.mxu0 }
 0x107   :  { %v1348_v60 = vpop.f32.mrf.mxu1 }
 0x108   :  { %v1643_v60 = vperm.slane %v2974_v63, 6 }
 0x10a   :  { %v1361_v61 = vpop.f32.mrf.mxu2 }
 0x10e   :  { %v1444_v5 = vpop.xlane.xlu0 %1443 }
 0x10f   :  { %v1445_v8 = vmul.f32 %v1444_v5, %v2965_v42 }
 0x111   :  { %v1446_v11 = vadd.f32 1e-05, %v1445_v8 }
 0x113   :  { %2671 = vrsqrt.f32 %v1446_v11  ;;  %vm1453_vm2 = vweird.f32 %v1446_v11 }
 0x119   :  { %v2672_v20 = vpop.eup %2671 }
 0x11a   :  { %v1448_v21 = vmul.f32 %v2672_v20, %v1446_v11  ;;  %vm1454_vm1 = vweird.f32 %v2672_v20 }
 0x11b   :  { %vm1455_vm3 = vmor %vm1453_vm2, %vm1454_vm1 }
 0x11c   :  { %v1449_v24 = vmul.f32 %v2672_v20, %v1448_v21  ;;  %v2635_v21 = vld [vmem:[#allocation10 + $0x8] sm:$0xff] }
 0x11d   :  { %1614 = vmatpush.bf16.msra.mxu1 %v2635_v21 }
 0x11e   :  { %v1450_v27 = vmul.f32 0.5, %v1449_v24  ;;  %v1385_v6 = vpop.f32.mrf.mxu0 }
 0x120   :  { %v1451_v31 = vsub.f32 1.5, %v1450_v27  ;;  %v1398_v9 = vpop.f32.mrf.mxu1 }
 0x121   :  { %1615 = vmatpush.bf16.msra.mxu1 %v2634_v22 }
 0x122   :  { %v1452_v32 = vmul.f32 %v2672_v20, %v1451_v31  ;;  %v1411_v11 = vpop.f32.mrf.mxu2  ;;  %v1559_v31 = vperm.slane %v2974_v63, 4 }
 0x124   :  { %v1456_v35 = vsel %vm1455_vm3, %v2672_v20, %v1452_v32 }
 0x125   :  { %v1457_v36 = vmul.f32 %v1456_v35, %v2970_v53  ;;  %v1372_v53 = vpop.f32.mrf.mxu3 }
 0x126   :  { %v1373_v5 = vadd.f32 %v1372_v53, %v1360_v2  ;;  %v1387_v15 = vpop.f32.mrf.mxu0 }
 0x127   :  { %v1459_v44 = vmul.f32 %v1458_v34, %v1457_v36 }
 0x128   :  { %v1386_v8 = vadd.f32 %v1385_v6, %v1373_v5  ;;  %v1400_v17 = vpop.f32.mrf.mxu1 }
 0x129   :  { %v1461_v46 = vadd.f32 %v1460_v37, %v1459_v44  ;;  %v2653_v44 = vld [vmem:[#allocation11 + $0x58] sm:$0xff] }
 0x12a   :  { %v1399_v10 = vadd.f32 %v1398_v9, %v1386_v8  ;;  %v1413_v19 = vpop.f32.mrf.mxu2  ;;  %1794 = vmatpush.bf16.msra.mxu3 %v2653_v44 }
 0x12b   :  { %v1462_v48 = vpack.c.bf16 %v1461_v46, %v1461_v46  ;;  %v2651_v46 = vld [vmem:[#allocation11 + $0x48] sm:$0xff] }
 0x12c   :  { %v1412_v12 = vadd.f32 %v1411_v11, %v1399_v10 }
 0x12d   :  { %1536 = vmatmul.bf16.vlgmr.msra.gmra.mxu0 %v1462_v48  ;;  %v1374_v62 = vpop.f32.mrf.mxu3 }
 0x12e   :  { %1795 = vmatpush.bf16.msra.mxu3 %v2652_v45  ;;  %v1803_v62 = vlaneseq }
 0x130   :  { %v1804_v2 = vand.u32 127, %v1803_v62 }
 0x132   :  { %1796 = vmatpush.bf16.msra.mxu3 %v2651_v46  ;;  %vm1805_vm7 = vcmp.lt.s32.totalorder %v1804_v2, 64 }
 0x136   :  { %1797 = vmatpush.bf16.msra.mxu3 %v2650_v47 }
 0x142   :  { %v1424_v13 = vpop.f32.mrf.mxu3 }
 0x143   :  { %v1425_v14 = vadd.f32 %v1424_v13, %v1412_v12 }
 0x145   :  { %v1428_v16 = vmax.f32 %v1425_v14, 0.0 }
 0x147   :  { %v1646_v18 = vpack.c.bf16 %v1428_v16, %v1428_v16 }
 0x149   :  { %1785 = vmatmul.bf16.vlgmr.msra.gmra.mxu2 %v1646_v18 }
 0x14a   :  { %v1426_v20 = vpop.f32.mrf.mxu3 }
 0x1aa   :  { %v1537_v24 = vpop.f32.mrf.mxu0 }
 0x1ab   :  { %v1538_v25 = vadd.f32 %v1537_v24, %v1479_v23 }
 0x1ad   :  { %v1541_v26 = vmax.f32 %v1538_v25, 0.0 }
 0x1af   :  { %v1542_v27 = vpack.c.bf16 %v1541_v26, %v1541_v26 }
 0x1b1   :  { %1616 = vmatmul.bf16.vlgmr.msra.gmra.mxu1 %v1542_v27 }
 0x1b2   :  { %v1539_v28 = vpop.f32.mrf.mxu0 }
 0x1cc   :  { %v1786_v29 = vpop.f32.mrf.mxu2 }
 0x1cd   :  { %v1787_v4 = vadd.f32 %v1786_v29, %v1680_v1 }
 0x1d4   :  { %v1788_v30 = vpop.f32.mrf.mxu2 }
 0x22e   :  { %v1617_v32 = vpop.f32.mrf.mxu1 }
 0x22f   :  { %v1618_v33 = vadd.f32 %v1617_v32, %v1559_v31 }
 0x231   :  { %1621 = vadd.xlane.f32.xlu1 %v1618_v33 }
 0x236   :  { %v1619_v34 = vpop.f32.mrf.mxu1 }
 0x2a4   :  { %v1622_v35 = vpop.xlane.xlu1 %1621 }
 0x2a5   :  { %v1623_v36 = vmul.f32 %v1622_v35, %v2965_v42 }
 0x2a7   :  { %v1624_v37 = vsub.f32 %v1618_v33, %v1623_v36 }
 0x2a9   :  { %v1625_v38 = vmul.f32 %v1624_v37, %v1624_v37 }
 0x2ab   :  { %1626 = vadd.xlane.f32.xlu1 %v1625_v38 }
 0x31e   :  { %v1627_v48 = vpop.xlane.xlu1 %1626 }
 0x31f   :  { %v1628_v49 = vmul.f32 %v1627_v48, %v2965_v42 }
 0x321   :  { %v1629_v50 = vadd.f32 1e-05, %v1628_v49 }
 0x323   :  { %2673 = vrsqrt.f32 %v1629_v50  ;;  %vm1636_vm5 = vweird.f32 %v1629_v50 }
 0x329   :  { %v2674_v51 = vpop.eup %2673 }
 0x32a   :  { %v1631_v52 = vmul.f32 %v2674_v51, %v1629_v50  ;;  %vm1637_vm4 = vweird.f32 %v2674_v51 }
 0x32b   :  { %vm1638_vm6 = vmor %vm1636_vm5, %vm1637_vm4 }
 0x32c   :  { %v1632_v54 = vmul.f32 %v2674_v51, %v1631_v52 }
 0x32e   :  { %v1633_v53 = vmul.f32 0.5, %v1632_v54 }
 0x330   :  { %v1634_v55 = vsub.f32 1.5, %v1633_v53 }
 0x332   :  { %v1635_v56 = vmul.f32 %v2674_v51, %v1634_v55 }
 0x334   :  { %v1639_v58 = vsel %vm1638_vm6, %v2674_v51, %v1635_v56 }
 0x335   :  { %v1640_v59 = vmul.f32 %v1639_v58, %v1624_v37 }
 0x337   :  { %v1642_v0 = vmul.f32 %v1641_v57, %v1640_v59 }
 0x339   :  { %v1644_v3 = vadd.f32 %v1643_v60, %v1642_v0 }
 0x33b   :  { %v1645_v42 = vmax.f32 %v1644_v3, 0.0 }
 0x33d   :  { %v1647_v61 = vpack.c.bf16 %v1645_v42, %v1645_v42 }
 0x33f   :  { %1798 = vmatmul.bf16.vlgmr.msra.gmra.mxu3 %v1647_v61 }
 0x3c2   :  { %v1799_v5 = vpop.f32.mrf.mxu3 }
 0x3c3   :  { %v1800_v6 = vadd.f32 %v1799_v5, %v1787_v4 }
 0x3c5   :  { %v1806_v7 = vmul.f32 %v1800_v6, %v1800_v6 }
 0x3c7   :  { %v1807_v8 = vsel %vm1805_vm7, %v1806_v7, 0.0  ;;  %v1810_v10 = vsel %vm1805_vm7, 0.0, %v1806_v7 }
 0x3c8   :  { %1808 = vadd.xlane.f32.xlu2 %v1807_v8 }
 0x3ca   :  { %v1801_v9 = vpop.f32.mrf.mxu3 }
 0x3d0   :  { %1811 = vadd.xlane.f32.xlu2 %v1810_v10 }
 0x43b   :  { %v1809_v11 = vpop.xlane.xlu2 %1808 }
 0x43c   :  { %v1813_v12 = vmax.f32 %v1809_v11, 1e-24 }
 0x43e   :  { %2675 = vrsqrt.f32 %v1813_v12  ;;  %vm1820_vm10 = vweird.f32 %v1813_v12 }
 0x443   :  { %v1812_v13 = vpop.xlane.xlu2 %1811 }
 0x444   :  { %v2676_v14 = vpop.eup %2675  ;;  %v1824_v15 = vmax.f32 %v1812_v13, 1e-24 }
 0x445   :  { %v1815_v63 = vmul.f32 %v2676_v14, %v1813_v12  ;;  %vm1821_vm8 = vweird.f32 %v2676_v14 }
 0x446   :  { %2677 = vrsqrt.f32 %v1824_v15  ;;  %vm1822_vm11 = vmor %vm1820_vm10, %vm1821_vm8  ;;  %vm1831_vm12 = vweird.f32 %v1824_v15 }
 0x447   :  { %v1816_v16 = vmul.f32 %v2676_v14, %v1815_v63 }
 0x449   :  { %v1817_v17 = vmul.f32 0.5, %v1816_v16 }
 0x44b   :  { %v1818_v20 = vsub.f32 1.5, %v1817_v17 }
 0x44c   :  { %v2678_v18 = vpop.eup %2677 }
 0x44d   :  { %v1826_v19 = vmul.f32 %v2678_v18, %v1824_v15  ;;  %v1819_v23 = vmul.f32 %v2676_v14, %v1818_v20  ;;  %vm1832_vm9 = vweird.f32 %v2678_v18 }
 0x44e   :  { %vm1833_vm13 = vmor %vm1831_vm12, %vm1832_vm9 }
 0x44f   :  { %v1827_v21 = vmul.f32 %v2678_v18, %v1826_v19  ;;  %v1823_v26 = vsel %vm1822_vm11, %v2676_v14, %v1819_v23 }
 0x451   :  { %v1828_v22 = vmul.f32 0.5, %v1827_v21 }
 0x453   :  { %v1829_v24 = vsub.f32 1.5, %v1828_v22 }
 0x455   :  { %v1830_v25 = vmul.f32 %v2678_v18, %v1829_v24 }
 0x457   :  { %v1834_v27 = vsel %vm1833_vm13, %v2678_v18, %v1830_v25 }
 0x458   :  { %v1835_v28 = vsel %vm1805_vm7, %v1823_v26, %v1834_v27 }
 0x459   :  { %v1836_v29 = vmul.f32 %v1835_v28, %v1800_v6 }
 0x45b   :  { %1837 = vst [vmem:[#allocation14] sm:$0xff] %v1836_v29 }
 0x45c   :  { %1848 = dma.vmem_to_hbm [thread:$0]  %s1844_s6, 128, %s1846_s12, [#allocation4]  }
 0x45d   :  { %2879 = dma.done.wait [#allocation4], 128  }
 0x45e   :  { %2880 = vsyncadd [#allocation4], 4294967168 }
 0x45f   :  { %1853 = vsyncpa [#allocation3], 1 }
 0x460   :  { %1854 = vsyncpa [#allocation6], 1 }
 0x461   :  { %1855 = vsyncpa [#allocation9], 1 }
 0x462   :  { %1856 = vsyncpa [#allocation12], 1 }
 0x463   :  { %1857 = vsyncpa [#allocation4], 1 }

</bundles_post_ra>
